<compile_context>
chip_gen: v7x
topology: tpu7x:2x2x1
jax: 0.10.0
libtpu: 0.0.40
codegen_flags: <defaults>
</compile_context>

<pallas_src>
import jax
import jax.numpy as jnp
from jax.experimental import pallas as pl
from jax.experimental.pallas import tpu as pltpu


def critic_kernel(x_ref, w_ref, b_ref, o_ref):
    # x_ref: [TB, F] (VMEM), w_ref: [1, F] (VMEM), b_ref: [1] (SMEM),
    # o_ref: [TB, 1] (VMEM, sublane-major -- no relayout of the reduce result).
    x = x_ref[...].astype(jnp.float32)                 # f32 accumulate (PyTorch parity)
    w = w_ref[...].astype(jnp.float32)
    row = jnp.sum(x * w, axis=-1, keepdims=True)       # VPU mul + XLU reduce -> [TB, 1]
    o_ref[...] = (row + b_ref[0]).astype(o_ref.dtype)


def critic_net_forward(mid_features, weight, bias):
    """mid_features: [B, F]; weight: [1, F] (PyTorch nn.Linear layout); bias: [1]."""
    B, F = mid_features.shape

    # ---- batch-tile selection ----------------------------------------------
    # Small B: one tile (no per-step pipeline overhead).
    # Large B: up to 4096-row tiles (multiple of 8), and at least 2 grid steps
    # so v7x's two TensorCores both get work (no-op on v5e/v6e).
    if B <= 1024:
        TB = B
    else:
        half = ((pl.cdiv(B, 2) + 7) // 8) * 8
        TB = min(4096, half)
    grid = (pl.cdiv(B, TB),)

    # ---- VMEM budget (double-buffered, lane-padded) --------------------------
    # Input tile pads F to a multiple of 128 lanes; the (TB, 1) output tile also
    # occupies 128 lanes per 8-row sublane group.
    lanes_f = max(((F + 127) // 128) * 128, 128)
    vmem_bytes = (2 * TB * lanes_f * 4        # x, double-buffered
                  + 2 * TB * 128 * 4          # out (TB,1), lane-padded, double-buffered
                  + 2 * lanes_f * 4)          # weight
    compiler_kwargs = dict(dimension_semantics=("parallel",))
    if vmem_bytes > (16 << 20):               # above v5e's default scoped VMEM
        compiler_kwargs["vmem_limit_bytes"] = min(int(vmem_bytes * 1.25) + (1 << 20),
                                                  48 << 20)

    return pl.pallas_call(
        critic_kernel,
        out_shape=jax.ShapeDtypeStruct((B, 1), mid_features.dtype),
        grid=grid,
        in_specs=[
            pl.BlockSpec((TB, F), lambda i: (i, 0)),                # x batch tile
            pl.BlockSpec((1, F), lambda i: (0, 0)),                 # weight, resident
            pl.BlockSpec(memory_space=pltpu.MemorySpace.SMEM),      # bias scalar in SMEM
        ],
        out_specs=pl.BlockSpec((TB, 1), lambda i: (i, 0)),          # [TB,1] block, no relayout
        compiler_params=pltpu.CompilerParams(**compiler_kwargs),
    )(mid_features, weight, bias)


def _reference(x, weight, bias):
    return (x.astype(jnp.float32) @ weight.astype(jnp.float32).T
            + bias.astype(jnp.float32)).astype(x.dtype)


if __name__ == "__main__":
    mid_features_size = 64   # matches default mid_features_size=64

    key = jax.random.PRNGKey(0)
    k_x, k_w, k_b, k_x2 = jax.random.split(key, 4)

    # Deterministic synthetic parameters (shapes from nn.Linear(64, 1, bias=True)).
    weight = jax.random.normal(k_w, (1, mid_features_size), dtype=jnp.float32) * 0.1
    bias = jax.random.normal(k_b, (1,), dtype=jnp.float32) * 0.1

    # --- primary check: module-default small shape (B=8) ---------------------
    batch = 8
    x = jax.random.normal(k_x, (batch, mid_features_size), dtype=jnp.float32)
    out = jax.block_until_ready(critic_net_forward(x, weight, bias))
    ref = _reference(x, weight, bias)
    assert out.shape == (batch, 1)
    assert jnp.allclose(out, ref, atol=1e-5, rtol=1e-5)

    # --- secondary check: larger batch exercising the multi-step parallel grid
    batch2 = 4096
    x2 = jax.random.normal(k_x2, (batch2, mid_features_size), dtype=jnp.float32)
    out2 = jax.block_until_ready(critic_net_forward(x2, weight, bias))
    ref2 = _reference(x2, weight, bias)
    assert out2.shape == (batch2, 1)
    assert jnp.allclose(out2, ref2, atol=1e-5, rtol=1e-5)

    print("KERNEL_OK")
</pallas_src>

<mosaic_0001>
module attributes {stable_mosaic.version = 11 : i64} {
  func.func @critic_kernel(%arg0: i32, %arg1: memref<8x64xf32, #tpu.memory_space<vmem>>, %arg2: memref<1x64xf32, #tpu.memory_space<vmem>>, %arg3: memref<1xf32, #tpu.memory_space<smem>>, %arg4: memref<8x1xf32, #tpu.memory_space<vmem>>) attributes {dimension_semantics = [#tpu.dimension_semantics<parallel>], iteration_bounds = array<i64: 1>, scalar_prefetch = 0 : i64, scratch_operands = 0 : i64, tpu.core_type = #tpu.core_type<tc>, window_params = [{transform_indices = @transform_0, window_bounds = array<i64: 8, 64>}, {pipeline_mode = #tpu.pipeline_mode<synchronous>, transform_indices = @transform_1, window_bounds = array<i64: 1, 64>}, {transform_indices = @transform_2, window_bounds = array<i64: 1>}, {transform_indices = @transform_3, window_bounds = array<i64: 8, 1>}]} {
    %c0 = arith.constant 0 : index
    %c0_0 = arith.constant 0 : index
    %0 = vector.load %arg1[%c0, %c0_0] : memref<8x64xf32, #tpu.memory_space<vmem>>, vector<8x64xf32>
    %c0_1 = arith.constant 0 : index
    %c0_2 = arith.constant 0 : index
    %1 = vector.load %arg2[%c0_1, %c0_2] : memref<1x64xf32, #tpu.memory_space<vmem>>, vector<1x64xf32>
    %2 = vector.broadcast %1 : vector<1x64xf32> to vector<8x64xf32>
    %3 = arith.mulf %0, %2 : vector<8x64xf32>
    %cst = arith.constant dense<0.000000e+00> : vector<8xf32>
    %4 = vector.multi_reduction <add>, %3, %cst [1] : vector<8x64xf32> to vector<8xf32>
    %5 = vector.shape_cast %4 : vector<8xf32> to vector<8x1xf32>
    %c0_3 = arith.constant 0 : index
    %6 = memref.load %arg3[%c0_3] : memref<1xf32, #tpu.memory_space<smem>>
    %7 = vector.broadcast %6 : f32 to vector<8x1xf32>
    %8 = arith.addf %5, %7 : vector<8x1xf32>
    %c0_4 = arith.constant 0 : index
    %c0_5 = arith.constant 0 : index
    %9 = vector.load %arg4[%c0_4, %c0_5] : memref<8x1xf32, #tpu.memory_space<vmem>>, vector<8x1xf32>
    tpu.vector_store %arg4[%c0_4, %c0_5], %8 {strides = array<i32>} : memref<8x1xf32, #tpu.memory_space<vmem>>, vector<8x1xf32>,
    return
  }
  func.func @transform_0(%arg0: i32) -> (i32, i32) {
    %c0_i32 = arith.constant 0 : i32
    %c0_i32_0 = arith.constant 0 : i32
    return %arg0, %c0_i32 : i32, i32
  }
  func.func @transform_1(%arg0: i32) -> (i32, i32) {
    %c0_i32 = arith.constant 0 : i32
    %c0_i32_0 = arith.constant 0 : i32
    %c0_i32_1 = arith.constant 0 : i32
    return %c0_i32, %c0_i32_0 : i32, i32
  }
  func.func @transform_2(%arg0: i32) -> i32 {
    %c0_i32 = arith.constant 0 : i32
    %c0_i32_0 = arith.constant 0 : i32
    return %c0_i32 : i32
  }
  func.func @transform_3(%arg0: i32) -> (i32, i32) {
    %c0_i32 = arith.constant 0 : i32
    %c0_i32_0 = arith.constant 0 : i32
    return %arg0, %c0_i32 : i32, i32
  }
}

</mosaic_0001>

<bundles_post_ra>
// kernel: tpu_custom_call.1
= control target key start
LH: loop header
LB: loop body
LE: loop exit
PB: predicated region body
PF: predicated region fallthrough
CT: control target
= control target key end

     0   :  { %9 = vsyncpa [#allocation4], 0  ;;  %s76_s12 = smov [#allocation3]   ;;  %s118_s0 = inlined_call_operand.hbm [shape: f32[8,64], index: 0, kind: input, shape index: {}]   ;;  %s119_s1 = inlined_call_operand.vmem [shape: f32[1,64], index: 1, kind: input, shape index: {}]   ;;  %s120_s2 = inlined_call_operand.<no memory space> [shape: f32[1], index: 2, kind: input, shape index: {}]   ;;  %s121_s3 = inlined_call_operand.vmem [shape: f32[8,1], index: 3, kind: output, shape index: {}]  }
   0x1   :  { %s16_s13 = sshll.u32 %s76_s12, 4  ;;  %s52_s16 = scalar_lea.hbm %s118_s0, 128  ;;  %s17_s13 = int_to_ptr.vmem [resolvable:$true] %s16_s13 }
   0x2   :  { %p53_p0 = scmp.ne.s32.totalorder %s118_s0, %s52_s16  ;;  %p56_p1 = scmp.lt.u32.totalorder %s52_s16, %s118_s0 }
   0x4   :  { %p58_p2 = pnand %p56_p1, %p53_p0 }
   0x6   :  { %61 = shalt.err (!%p58_p2)
}
   0x7   :  { %s62_s21 = scalar_lea.vmem %s17_s13, 128  ;;  %p67_p4 = scmp.lt.s32.totalorder %s17_s13, %s17_s13 }
   0x8   :  { %p63_p3 = scmp.ne.s32.totalorder %s17_s13, %s62_s21  ;;  %p68_p5 = scmp.lt.s32.totalorder %s62_s21, %s62_s21 }
   0xa   :  { %p69_p6 = por %p68_p5, %p67_p4 }
   0xc   :  { %p70_p7 = pnand %p69_p6, %p63_p3 }
   0xe   :  { %73 = shalt.err (!%p70_p7)
}
   0xf   :  { %19 = dma.hbm_to_vmem [thread:$0]  %s118_s0, 128, %s17_s13, [#allocation4]  }
  0x10   :  { %74 = dma.done.wait [#allocation4], 128  }
  0x11   :  { %75 = vsyncadd [#allocation4], 4294967168  ;;  %v27_v0 = vld [vmem:[#allocation3] sm:$0xff]  ;;  %vm36_vm0 = vcmask 523264   ;;  %v41_v4 = vstv %s120_s2  ;;  %vm43_vm1 = vcmask 7168  }
  0x12   :  { %v50_v1 = vld [vmem:[%s119_s1] ss:$0 sm:$0xff] }
  0x13   :  { %v35_v2 = vmul.f32 %v50_v1, %v27_v0 }
  0x15   :  { %v37_v3 = vsel %vm36_vm0, %v35_v2, 0.0 }
  0x16   :  { %38 = vadd.xlane.f32.xlu0 %v37_v3 }
  0xa3   :  { %v39_v5 = vpop.xlane.xlu0 %38 }
  0xa4   :  { %v42_v6 = vadd.f32 %v41_v4, %v39_v5 }
  0xa6   :  { %44 = vst.msk [vmem:[%s121_s3] sm:$0xff] %vm43_vm1, %v42_v6 }
  0xa7   :  { %49 = vsyncpa [#allocation4], 1 }

</bundles_post_ra>
